<compile_context>
chip_gen: v7x
topology: tpu7x:2x2x1
jax: 0.10.0
libtpu: 0.0.40
codegen_flags: <defaults>
</compile_context>

<pallas_src>
import math
import jax
import jax.numpy as jnp
from jax.experimental import pallas as pl
from jax.experimental.pallas import tpu as pltpu

NODES = 8   # graph nodes (H dim), fixed by adj = ones(8, 8)
FEAT = 7    # per-node feature width (W dim), fixed by the "* 7" parameter shapes


def _spatial_conv_gnn_kernel(xr_ref, wconv_ref, wamb_ref, wb_ref,
                             conv_ref, gnn_ref):
    """One row-block of the fused 1x1-conv + GNN(indicator==1) forward.

    xr_ref   : (R, Din)   node-major activations, R = (#batches in block) * 8
    wconv_ref: (Din, Dout) kron(W_conv^T, I_7)        -> 1x1 conv as matmul
    wamb_ref : (Din, Dout) W_cat[:Din] - W_cat[Din:]  -> "self" term
    wb_ref   : (Din, Dout) W_cat[Din:]                -> "neighbor-sum" term
    conv_ref : (R, Dout)  conv output, same node-major layout
    gnn_ref  : (R, Dout)  GNN output (bias added in the wrapper fusion)
    """
    xr = xr_ref[...]
    R, Din = xr.shape
    nb = R // NODES

    # 1x1 conv on the MXU, in the shared node-major layout.
    conv_ref[...] = jnp.dot(xr, wconv_ref[...], preferred_element_type=jnp.float32)

    # Neighbor aggregation: (ones(8,8) - I) @ x == (row-sum over the 8 nodes) - x,
    # algebraically folded into the weights (no adjacency matrix, no O(B^2) matmul):
    #   gnn = x @ (Wa - Wb) + rowsum @ Wb
    rowsum = jnp.sum(xr.astype(jnp.float32).reshape(nb, NODES, Din), axis=1)  # (nb, Din)
    sb = jnp.dot(rowsum.astype(xr.dtype), wb_ref[...],
                 preferred_element_type=jnp.float32)                          # (nb, Dout)
    gnn = jnp.dot(xr, wamb_ref[...], preferred_element_type=jnp.float32)      # (R, Dout)
    Dout = gnn.shape[1]
    gnn_ref[...] = (gnn.reshape(nb, NODES, Dout) + sb[:, None, :]).reshape(R, Dout)


def spatial_layer_forward(x, ws_input, w_cat, b_cat, *,
                          compute_dtype=None, block_rows_target=512):
    """Forward pass of Spatial_layer (indicator == 1)."""
    B, Cin, H, W = x.shape
    assert H == NODES and W == FEAT, "module requires H == 8, W == 7"
    out_dim = ws_input.shape[0]
    assert Cin == out_dim, "module's reshape only works when in_dim == out_dim"
    Din = Cin * FEAT
    Dout = out_dim * FEAT
    cdt = jnp.dtype(x.dtype if compute_dtype is None else compute_dtype)

    # ---- plain-JAX glue: layout plumbing / parameter folding only ----------
    # node-major slab: xr[b*8+h, c*7+w] = x[b, c, h, w]
    xr = jnp.transpose(x, (0, 2, 1, 3)).reshape(B * NODES, Din)
    # 1x1 conv as a matmul in the same layout:
    #   Wconv[c*7+w, o*7+w'] = W[o, c] * delta(w, w')  == kron(W^T, I_7)
    w2d = ws_input[:, :, 0, 0]                                        # (out, in)
    w_conv = jnp.kron(jnp.transpose(w2d), jnp.eye(FEAT, dtype=w2d.dtype))
    # neighbor matmul folded into W_cat (concat split + sum-minus-self identity):
    wcat_a, wcat_b = w_cat[:Din], w_cat[Din:]
    w_amb = wcat_a - wcat_b

    rows = B * NODES
    block_rows = min(rows, block_rows_target)          # both multiples of 8
    n_blocks = pl.cdiv(rows, block_rows)
    padded_rows = n_blocks * block_rows
    if padded_rows != rows:                            # whole 8-row groups of zeros
        xr = jnp.pad(xr, ((0, padded_rows - rows), (0, 0)))

    xr = xr.astype(cdt)
    w_conv = w_conv.astype(cdt)
    w_amb = w_amb.astype(cdt)
    wcat_b = wcat_b.astype(cdt)

    flops = 2 * padded_rows * Din * Dout * 2 + 2 * (padded_rows // NODES) * Din * Dout
    bytes_accessed = (cdt.itemsize * (padded_rows * Din + 3 * Din * Dout)
                      + 4 * 2 * padded_rows * Dout)

    conv_flat, gnn_flat = pl.pallas_call(
        _spatial_conv_gnn_kernel,
        out_shape=(jax.ShapeDtypeStruct((padded_rows, Dout), jnp.float32),
                   jax.ShapeDtypeStruct((padded_rows, Dout), jnp.float32)),
        grid_spec=pltpu.PrefetchScalarGridSpec(
            num_scalar_prefetch=0,
            grid=(n_blocks,),
            in_specs=[
                pl.BlockSpec((block_rows, Din), lambda i: (i, 0)),
                pl.BlockSpec((Din, Dout), lambda i: (0, 0)),
                pl.BlockSpec((Din, Dout), lambda i: (0, 0)),
                pl.BlockSpec((Din, Dout), lambda i: (0, 0)),
            ],
            out_specs=(pl.BlockSpec((block_rows, Dout), lambda i: (i, 0)),
                       pl.BlockSpec((block_rows, Dout), lambda i: (i, 0))),
        ),
        compiler_params=pltpu.CompilerParams(
            dimension_semantics=("parallel",),
            vmem_limit_bytes=32 * 1024 * 1024),
        cost_estimate=pl.CostEstimate(flops=flops, transcendentals=0,
                                      bytes_accessed=bytes_accessed),
    )(xr, w_conv, w_amb, wcat_b)

    conv_flat = conv_flat[:rows]
    gnn_flat = gnn_flat[:rows]

    # ---- wrapper epilogue (single XLA fusion): bias + PyTorch's digit-mixing
    # reshape(C, T, B, -1); transpose(0, 2) + add + relu (pure layout/elementwise).
    x_input = jnp.transpose(conv_flat.reshape(B, NODES, out_dim, FEAT), (0, 2, 1, 3))
    y = gnn_flat + b_cat.reshape(1, Dout).astype(jnp.float32)
    y = jnp.transpose(y.reshape(NODES, Cin, B, -1), (2, 1, 0, 3))
    return jax.nn.relu(x_input + y)


def reference_forward(x, ws_input, w_cat, b_cat):
    """Pure-JAX mirror of the PyTorch forward (indicator == 1)."""
    B, T, C, Fd = x.shape
    w2d = ws_input[:, :, 0, 0]
    x_input = jnp.einsum('bchw,oc->bohw', x, w2d)
    xr = jnp.transpose(x, (0, 2, 1, 3)).reshape(B, C, T * Fd)
    nadj = jnp.ones((8, 8), x.dtype) - jnp.eye(8, dtype=x.dtype)
    neighbor = jnp.einsum('ij,bjd->bid', nadj, xr)
    cat = jnp.concatenate([xr, neighbor], axis=2)
    y = cat @ w_cat + b_cat
    y = jnp.transpose(y.reshape(C, T, B, -1), (2, 1, 0, 3))
    return jax.nn.relu(x_input + y)


if __name__ == "__main__":
    key = jax.random.PRNGKey(0)
    B, in_dim, out_dim = 2, 4, 4  # in_dim must equal out_dim; H=8, W=7 fixed
    k_x, k_w, k_wcat, k_bcat = jax.random.split(key, 4)

    x = jax.random.normal(k_x, (B, in_dim, NODES, FEAT), jnp.float32)

    # Deterministic parameter init (matching nn.init.xavier_uniform_ shapes).
    def xavier(k, shape, fan_in, fan_out):
        bound = math.sqrt(6.0 / (fan_in + fan_out))
        return jax.random.uniform(k, shape, jnp.float32, -bound, bound)

    ws_input = xavier(k_w, (out_dim, in_dim, 1, 1), in_dim, out_dim)
    w_cat = xavier(k_wcat, (in_dim * FEAT * 2, out_dim * FEAT),
                   out_dim * FEAT, in_dim * FEAT * 2)
    b_cat = jax.random.normal(k_bcat, (out_dim * FEAT,), jnp.float32)
    # NOTE: W_gnn*/B_gnn*/W_att*/WQ*/WK*/MHA/concat_att params do not affect the
    # indicator==1 forward output (the MHA result `a` is discarded), so they are
    # not materialized here.
    # TODO(synk): indicator==0/2 paths (MultiheadAttention weights) and
    # self_attention_adj (topk-based adj update) are not implemented.

    out = jax.jit(spatial_layer_forward)(x, ws_input, w_cat, b_cat)
    jax.block_until_ready(out)

    ref = reference_forward(x, ws_input, w_cat, b_cat)
    assert out.shape == (B, out_dim, NODES, FEAT)
    assert jnp.allclose(out, ref, atol=1e-4, rtol=1e-4), "mismatch vs reference"
    print("KERNEL_OK")
</pallas_src>

<mosaic_0001>
module attributes {stable_mosaic.version = 11 : i64} {
  func.func @_spatial_conv_gnn_kernel(%arg0: i32, %arg1: memref<16x28xf32, #tpu.memory_space<vmem>>, %arg2: memref<28x28xf32, #tpu.memory_space<vmem>>, %arg3: memref<28x28xf32, #tpu.memory_space<vmem>>, %arg4: memref<28x28xf32, #tpu.memory_space<vmem>>, %arg5: memref<16x28xf32, #tpu.memory_space<vmem>>, %arg6: memref<16x28xf32, #tpu.memory_space<vmem>>) attributes {dimension_semantics = [#tpu.dimension_semantics<parallel>], iteration_bounds = array<i64: 1>, scalar_prefetch = 0 : i64, scratch_operands = 0 : i64, tpu.core_type = #tpu.core_type<tc>, window_params = [{transform_indices = @transform_0, window_bounds = array<i64: 16, 28>}, {pipeline_mode = #tpu.pipeline_mode<synchronous>, transform_indices = @transform_1, window_bounds = array<i64: 28, 28>}, {pipeline_mode = #tpu.pipeline_mode<synchronous>, transform_indices = @transform_2, window_bounds = array<i64: 28, 28>}, {pipeline_mode = #tpu.pipeline_mode<synchronous>, transform_indices = @transform_3, window_bounds = array<i64: 28, 28>}, {transform_indices = @transform_4, window_bounds = array<i64: 16, 28>}, {transform_indices = @transform_5, window_bounds = array<i64: 16, 28>}]} {
    %c0 = arith.constant 0 : index
    %c0_0 = arith.constant 0 : index
    %0 = vector.load %arg1[%c0, %c0_0] : memref<16x28xf32, #tpu.memory_space<vmem>>, vector<16x28xf32>
    %c0_1 = arith.constant 0 : index
    %c0_2 = arith.constant 0 : index
    %1 = vector.load %arg2[%c0_1, %c0_2] : memref<28x28xf32, #tpu.memory_space<vmem>>, vector<28x28xf32>
    %cst = arith.constant dense<0.000000e+00> : vector<16x28xf32>
    %2 = tpu.matmul %0, %1, %cst {dimension_numbers = #tpu.dot_dimension_numbers<[1], [0], [0], [1], [0, 0, 1, 1], [], []>} : vector<16x28xf32>, vector<28x28xf32>, vector<16x28xf32> -> vector<16x28xf32>
    %c0_3 = arith.constant 0 : index
    %c0_4 = arith.constant 0 : index
    %3 = vector.load %arg5[%c0_3, %c0_4] : memref<16x28xf32, #tpu.memory_space<vmem>>, vector<16x28xf32>
    tpu.vector_store %arg5[%c0_3, %c0_4], %2 {strides = array<i32>} : memref<16x28xf32, #tpu.memory_space<vmem>>, vector<16x28xf32>,
    %4 = vector.shape_cast %0 : vector<16x28xf32> to vector<2x8x28xf32>
    %cst_5 = arith.constant dense<0.000000e+00> : vector<2x28xf32>
    %5 = vector.multi_reduction <add>, %4, %cst_5 [1] : vector<2x8x28xf32> to vector<2x28xf32>
    %c0_6 = arith.constant 0 : index
    %c0_7 = arith.constant 0 : index
    %6 = vector.load %arg4[%c0_6, %c0_7] : memref<28x28xf32, #tpu.memory_space<vmem>>, vector<28x28xf32>
    %cst_8 = arith.constant dense<0.000000e+00> : vector<2x28xf32>
    %7 = tpu.matmul %5, %6, %cst_8 {dimension_numbers = #tpu.dot_dimension_numbers<[1], [0], [0], [1], [0, 0, 1, 1], [], []>} : vector<2x28xf32>, vector<28x28xf32>, vector<2x28xf32> -> vector<2x28xf32>
    %c0_9 = arith.constant 0 : index
    %c0_10 = arith.constant 0 : index
    %8 = vector.load %arg3[%c0_9, %c0_10] : memref<28x28xf32, #tpu.memory_space<vmem>>, vector<28x28xf32>
    %cst_11 = arith.constant dense<0.000000e+00> : vector<16x28xf32>
    %9 = tpu.matmul %0, %8, %cst_11 {dimension_numbers = #tpu.dot_dimension_numbers<[1], [0], [0], [1], [0, 0, 1, 1], [], []>} : vector<16x28xf32>, vector<28x28xf32>, vector<16x28xf32> -> vector<16x28xf32>
    %10 = vector.shape_cast %9 : vector<16x28xf32> to vector<2x8x28xf32>
    %11 = vector.shape_cast %7 : vector<2x28xf32> to vector<2x1x28xf32>
    %12 = vector.broadcast %11 : vector<2x1x28xf32> to vector<2x8x28xf32>
    %13 = arith.addf %10, %12 : vector<2x8x28xf32>
    %14 = vector.shape_cast %13 : vector<2x8x28xf32> to vector<16x28xf32>
    %c0_12 = arith.constant 0 : index
    %c0_13 = arith.constant 0 : index
    %15 = vector.load %arg6[%c0_12, %c0_13] : memref<16x28xf32, #tpu.memory_space<vmem>>, vector<16x28xf32>
    tpu.vector_store %arg6[%c0_12, %c0_13], %14 {strides = array<i32>} : memref<16x28xf32, #tpu.memory_space<vmem>>, vector<16x28xf32>,
    return
  }
  func.func @transform_0(%arg0: i32) -> (i32, i32) {
    %c0_i32 = arith.constant 0 : i32
    %c0_i32_0 = arith.constant 0 : i32
    return %arg0, %c0_i32 : i32, i32
  }
  func.func @transform_1(%arg0: i32) -> (i32, i32) {
    %c0_i32 = arith.constant 0 : i32
    %c0_i32_0 = arith.constant 0 : i32
    %c0_i32_1 = arith.constant 0 : i32
    return %c0_i32, %c0_i32_0 : i32, i32
  }
  func.func @transform_2(%arg0: i32) -> (i32, i32) {
    %c0_i32 = arith.constant 0 : i32
    %c0_i32_0 = arith.constant 0 : i32
    %c0_i32_1 = arith.constant 0 : i32
    return %c0_i32, %c0_i32_0 : i32, i32
  }
  func.func @transform_3(%arg0: i32) -> (i32, i32) {
    %c0_i32 = arith.constant 0 : i32
    %c0_i32_0 = arith.constant 0 : i32
    %c0_i32_1 = arith.constant 0 : i32
    return %c0_i32, %c0_i32_0 : i32, i32
  }
  func.func @transform_4(%arg0: i32) -> (i32, i32) {
    %c0_i32 = arith.constant 0 : i32
    %c0_i32_0 = arith.constant 0 : i32
    return %arg0, %c0_i32 : i32, i32
  }
  func.func @transform_5(%arg0: i32) -> (i32, i32) {
    %c0_i32 = arith.constant 0 : i32
    %c0_i32_0 = arith.constant 0 : i32
    return %arg0, %c0_i32 : i32, i32
  }
}

</mosaic_0001>

<bundles_post_ra>
// kernel: sub.1
= control target key start
LH: loop header
LB: loop body
LE: loop exit
PB: predicated region body
PF: predicated region fallthrough
CT: control target
= control target key end

     0   :  { %s100_s0 = inlined_call_operand.vmem [shape: f32[28,28], index: 0, kind: input, shape index: {}]   ;;  %s101_s1 = inlined_call_operand.vmem [shape: f32[28,28], index: 1, kind: input, shape index: {}]   ;;  %s102_s2 = inlined_call_operand.vmem [shape: f32[28,28], index: 2, kind: output, shape index: {}]  }
   0x1   :  { %v3_v0 = vld [vmem:[%s100_s0] sm:$0xff]  ;;  %v40_v2 = vld [vmem:[%s100_s0 + $0x8] sm:$0xff]  ;;  %v43_v5 = vld [vmem:[%s100_s0 + $0x10] sm:$0xff] }
   0x2   :  { %v4_v1 = vld [vmem:[%s101_s1] sm:$0xff]  ;;  %v41_v4 = vld [vmem:[%s101_s1 + $0x8] sm:$0xff]  ;;  %v44_v6 = vld [vmem:[%s101_s1 + $0x10] sm:$0xff] }
   0x3   :  { %v7_v3 = vsub.f32 %v3_v0, %v4_v1  ;;  %v16_v7 = vsub.f32 %v40_v2, %v41_v4  ;;  %v26_v8 = vsub.f32 %v43_v5, %v44_v6  ;;  %v46_v9 = vld [vmem:[%s100_s0 + $0x18] sm:$0xff] }
   0x4   :  { %v47_v10 = vld [vmem:[%s101_s1 + $0x18] sm:$0xff] }
   0x5   :  { %9 = vst [vmem:[%s102_s2] sm:$0xff] %v7_v3  ;;  %v36_v11 = vsub.f32 %v46_v9, %v47_v10  ;;  %42 = vst [vmem:[%s102_s2 + $0x8] sm:$0xff] %v16_v7 }
   0x6   :  { %45 = vst [vmem:[%s102_s2 + $0x10] sm:$0xff] %v26_v8 }
   0x7   :  { %48 = vst [vmem:[%s102_s2 + $0x18] sm:$0xff] %v36_v11 }

// kernel: spatial_layer_forward.1
= control target key start
LH: loop header
LB: loop body
LE: loop exit
PB: predicated region body
PF: predicated region fallthrough
CT: control target
= control target key end

     0   :  { %vm32_vm0 = vcmask 1043456   ;;  %v427_v2 = vmov 0.0|0.0   ;;  %vm25_vm1 = vcmask 228352   ;;  %vm428_vm2 = vmmov 1   ;;  %s541_s1 = inlined_call_operand.vmem [shape: f32[28,28], index: 1, kind: input, shape index: {}]   ;;  %s542_s3 = inlined_call_operand.vmem [shape: f32[28,28], index: 3, kind: input, shape index: {}]   ;;  %s543_s0 = inlined_call_operand.vmem [shape: f32[16,28], index: 0, kind: input, shape index: {}]   ;;  %s544_s2 = inlined_call_operand.vmem [shape: f32[28,28], index: 2, kind: input, shape index: {}]   ;;  %s545_s4 = inlined_call_operand.vmem [shape: f32[16,28], index: 4, kind: output, shape index: {0}]   ;;  %s546_s5 = inlined_call_operand.vmem [shape: f32[16,28], index: 5, kind: output, shape index: {1}]  }
   0x1   :  { %v21_v0 = vld [vmem:[%s541_s1] sm:$0xff]  ;;  %v22_v1 = vld [vmem:[%s541_s1 + $0x8] sm:$0xff]  ;;  %405 = vmatprep.subr.bf16.mxu1 %v427_v2  ;;  %v23_v3 = vld [vmem:[%s541_s1 + $0x10] sm:$0xff]  ;;  %vm429_vm4 = vmmov 0   ;;  %v430_v8 = vmov 0.0   ;;  %vm133_vm5 = vcmask 1041409   ;;  %v296_v40 = vlaneseq }
   0x2   :  { %v395_v4 = vpack.c.bf16 %v22_v1, %v21_v0  ;;  %v24_v5 = vld [vmem:[%s541_s1 + $0x18] sm:$0xf]  ;;  %vm474_vm3 = vmpackc.low %vm32_vm0, %vm428_vm2  ;;  %v127_v7 = vld [vmem:[%s542_s3] sm:$0xff]  ;;  %381 = vmatprep.mubr.msk.f32.mxu1 %vm429_vm4, %v430_v8  ;;  %v431_v38 = vmov 1966171168  }
   0x3   :  { %v399_v9 = vpack.c.bf16 %v24_v5, %v23_v3  ;;  %v128_v10 = vld [vmem:[%s542_s3 + $0x8] sm:$0xff]  ;;  %v19_v11 = vld [vmem:[%s543_s0] sm:$0xff]  ;;  %v129_v12 = vld [vmem:[%s542_s3 + $0x10] sm:$0xff]  ;;  %v294_v39 = vunpack.c.l.s4 %v431_v38  ;;  %v297_v44 = vshrl.u32 %v296_v40, 7 }
   0x4   :  { %396 = vmatprep.subr.bf16.mxu0 %v395_v4  ;;  %v406_v13 = vpack.c.bf16 %v128_v10, %v127_v7  ;;  %370 = vmatprep.mubr.msk.f32.mxu0 %vm25_vm1, %v19_v11  ;;  %v113_v14 = vsel %vm25_vm1, %v19_v11, 0.0  ;;  %v130_v15 = vld [vmem:[%s542_s3 + $0x18] sm:$0xf]  ;;  %v210_v16 = vld [vmem:[%s544_s2] sm:$0xff]  ;;  %v211_v17 = vld [vmem:[%s544_s2 + $0x8] sm:$0xff] }
   0x5   :  { %398 = vmatpush3.bf16.msra.mxu0 %v395_v4  ;;  %v114_v18 = vrot.slane %v113_v14, 4  ;;  %v20_v19 = vld [vmem:[%s543_s0 + $0x8] sm:$0xff]  ;;  %v409_v20 = vpack.c.bf16 %v130_v15, %v129_v12  ;;  %v412_v21 = vpack.c.bf16 %v211_v17, %v210_v16  ;;  %v212_v25 = vld [vmem:[%s544_s2 + $0x10] sm:$0xff]  ;;  %v213_v26 = vld [vmem:[%s544_s2 + $0x18] sm:$0xf]  ;;  %v295_v43 = vunpack.c.0.s8 %v294_v39 }
   0x6   :  { %401 = vmatprep.subr.msk.bf16.mxu0 %vm474_vm3, %v399_v9  ;;  %407 = vmatpush3.bf16.msra.mxu1 %v406_v13  ;;  %v120_v22 = vsel %vm25_vm1, %v20_v19, 0.0  ;;  %v416_v29 = vpack.c.bf16 %v213_v26, %v212_v25  ;;  %v317_v50 = vsub.s32 0, %v297_v44 }
   0x7   :  { %408 = vmatprep.subr.bf16.mxu1 %v427_v2  ;;  %v115_v23 = vadd.f32 %v114_v18, %v113_v14  ;;  %v121_v24 = vrot.slane %v120_v22, 4  ;;  %v298_v45 = vsub.s32 %v295_v43, %v297_v44 }
   0x9   :  { %404 = vmatpush3.bf16.msk.msra.mxu0 %vm474_vm3, %v399_v9  ;;  %v116_v27 = vrot.slane %v115_v23, 2  ;;  %v122_v28 = vadd.f32 %v121_v24, %v120_v22 }
   0xa   :  { %411 = vmatpush3.bf16.msk.msra.mxu1 %vm474_vm3, %v409_v20  ;;  %413 = vmatprep.subr.bf16.mxu0 %v412_v21 }
   0xb   :  { %v117_v30 = vadd.f32 %v116_v27, %v115_v23  ;;  %v123_v31 = vrot.slane %v122_v28, 2 }
   0xc   :  { %371 = vmatmul.mubr.msk.f32.vlgmr.msra.gmra.mrb[0].mxu0 %vm25_vm1, %v20_v19 }
   0xd   :  { %v118_v32 = vrot.slane %v117_v30, 1  ;;  %v124_v33 = vadd.f32 %v123_v31, %v122_v28  ;;  %415 = vmatpush3.bf16.msra.mxu0 %v412_v21  ;;  %392 = vmatprep.mubr.msk.f32.mxu0 %vm25_vm1, %v19_v11 }
   0xe   :  { %418 = vmatprep.subr.msk.bf16.mxu0 %vm474_vm3, %v416_v29 }
   0xf   :  { %v119_v34 = vadd.f32 %v118_v32, %v117_v30  ;;  %v125_v35 = vrot.slane %v124_v33, 1 }
  0x11   :  { %v126_v36 = vadd.f32 %v125_v35, %v124_v33  ;;  %421 = vmatpush3.bf16.msk.msra.mxu0 %vm474_vm3, %v416_v29 }
  0x13   :  { %v134_v37 = vsel %vm133_vm5, %v126_v36, %v119_v34 }
  0x14   :  { %382 = vmatmul.mubr.msk.f32.vlgmr.msra.gmra.mrb[0].mxu1 %vm25_vm1, %v134_v37  ;;  %393 = vmatmul.mubr.msk.f32.vlgmr.msra.gmra.mrb[2].mxu0 %vm25_vm1, %v20_v19 }
  0xdf   :  { %v372_v41 = vpop.f32.mrb[0].mxu0 }
  0xe0   :  { %112 = vst.msk [vmem:[%s545_s4 + $0x8] sm:$0xff] %vm25_vm1, %v372_v41  ;;  %v102_v42 = vpop.f32.mrb[1].mxu0 }
  0xe1   :  { %111 = vst.msk [vmem:[%s545_s4] sm:$0xff] %vm25_vm1, %v102_v42 }
  0xe7   :  { %v206_v46 = vpop.f32.mrb[0].mxu1  ;;  %v394_v47 = vpop.f32.mrb[2].mxu0 }
  0xe8   :  { %v299_v48 = vrot.slane %v206_v46, %v298_v45  ;;  %v383_v49 = vpop.f32.mrb[1].mxu1  ;;  %v283_v51 = vpop.f32.mrb[3].mxu0 }
  0xea   :  { %v300_v52 = vcombine.high %v299_v48, %v299_v48  ;;  %v307_v53 = vrot.slane %v299_v48, %v298_v45 }
  0xec   :  { %v314_v54 = vrot.slane %v300_v52, %v298_v45  ;;  %v318_v55 = vrot.slane %v307_v53, %v317_v50 }
  0xee   :  { %v322_v56 = vrot.slane %v314_v54, %v317_v50  ;;  %v325_v57 = vadd.f32 %v318_v55, %v283_v51 }
  0xf0   :  { %v326_v58 = vadd.f32 %v394_v47, %v322_v56  ;;  %327 = vst.msk [vmem:[%s546_s5] sm:$0xff] %vm25_vm1, %v325_v57 }
  0xf2   :  { %328 = vst.msk [vmem:[%s546_s5 + $0x8] sm:$0xff] %vm25_vm1, %v326_v58 }

</bundles_post_ra>
